<compile_context>
chip_gen: v5e
topology: v5e:2x2
jax: 0.10.0
libtpu: 0.0.40
codegen_flags: <defaults>
</compile_context>

<pallas_src>
import jax
import jax.numpy as jnp
from jax.experimental import pallas as pl
from jax.experimental.pallas import tpu as pltpu

_LANE = 128
_ROW_CHUNK = 256   # table-row chunk per MXU push (bounds one-hot vreg pressure)


def _round_up(x: int, m: int) -> int:
    return ((x + m - 1) // m) * m


def _pad_rows(r: int) -> int:
    if r <= _ROW_CHUNK:
        return _round_up(r, _LANE)
    return _round_up(r, _ROW_CHUNK)


def _onehot_gather_t(ids, table_t_ref, chunk, precision):
    """table[:, id] for each lane id, via a chunked one-hot MXU contraction.

    ids:         (1, W) int32, lane-dense.
    table_t_ref: (D, R) ref, R a multiple of `chunk`, bf16 or f32.
    returns:     (D, W) float32; out-of-range id -> all-zero column.
    """
    d, r = table_t_ref.shape
    w = ids.shape[1]
    n_chunks = r // chunk

    def chunk_dot(off):
        rows = jax.lax.broadcasted_iota(jnp.int32, (chunk, w), 0) + off
        one_hot = (rows == ids).astype(table_t_ref.dtype)          # (chunk, W)
        tab = table_t_ref[:, pl.ds(off, chunk)]                    # (D, chunk)
        return jnp.dot(tab, one_hot,
                       precision=precision,
                       preferred_element_type=jnp.float32)         # (D, W) f32

    if n_chunks == 1:
        return chunk_dot(0)

    def body(c, acc):
        return acc + chunk_dot(pl.multiple_of(c * chunk, chunk))

    return jax.lax.fori_loop(0, n_chunks, body,
                             jnp.zeros((d, w), jnp.float32),
                             unroll=(n_chunks <= 8))


def bpr_mf_forward(uids, pos_iids, neg_iids, user_emb, item_emb, *,
                   batch_tile=128, table_dtype=jnp.bfloat16):
    batch = uids.shape[0]
    n_user, latent_dim = user_emb.shape
    n_item = item_emb.shape[0]

    tb = batch_tile
    assert tb % _LANE == 0, "batch_tile must be a multiple of 128 (lane width)"
    # At least 2 grid steps so dimension_semantics=("parallel",) lets v7x's two
    # TensorCores split the batch; neutral/cheap on single-TC v5e/v6e.
    b_pad = _round_up(max(batch, 2 * tb), tb)
    n_steps = b_pad // tb

    ru_pad = _pad_rows(n_user)
    ri_pad = _pad_rows(n_item)
    chunk_u = min(_ROW_CHUNK, ru_pad)
    chunk_i = min(_ROW_CHUNK, ri_pad)

    exact_f32 = (table_dtype == jnp.float32)
    precision = (jax.lax.Precision.HIGHEST if exact_f32
                 else jax.lax.Precision.DEFAULT)

    # Pre-transposed, zero-padded tables: (D, R_pad); padded rows never match.
    def _prep_table(tab, r_pad):
        tab = jnp.pad(tab.astype(jnp.float32),
                      ((0, r_pad - tab.shape[0]), (0, 0)))
        return jnp.transpose(tab).astype(table_dtype)              # (D, r_pad)

    user_t = _prep_table(user_emb, ru_pad)
    item_t = _prep_table(item_emb, ri_pad)

    def _pad_ids(ids):
        ids = ids.astype(jnp.int32).reshape(1, batch)
        # Pad with -1: padded lanes match no table row -> exact 0.0 output.
        return jnp.pad(ids, ((0, 0), (0, b_pad - batch)), constant_values=-1)

    u_ids = _pad_ids(uids)                                         # (1, b_pad)
    p_ids = _pad_ids(pos_iids)
    n_ids = _pad_ids(neg_iids)
    # Interleave [pos_tile | neg_tile] per batch tile so the kernel's fused item
    # gather sees one contiguous lane-dense (1, 2*tb) id block per grid step.
    pn_ids = jnp.stack([p_ids.reshape(n_steps, tb),
                        n_ids.reshape(n_steps, tb)], axis=1)       # (n_steps, 2, tb)
    pn_ids = pn_ids.reshape(1, 2 * b_pad)

    def kernel(u_ids_ref, pn_ids_ref, user_t_ref, item_t_ref, out_ref):
        # Gathered rows, batch lane-dense: (D, tb) and (D, 2*tb), f32.
        u = _onehot_gather_t(u_ids_ref[...], user_t_ref, chunk_u, precision)
        pn = _onehot_gather_t(pn_ids_ref[...], item_t_ref, chunk_i, precision)
        p = pn[:, :tb]
        n = pn[:, tb:]
        # Fused multiply + reduce over the latent (sublane) axis; result is
        # already lane-dense in batch -> single (2, tb) store, no transpose.
        pos = jnp.sum(u * p, axis=0, keepdims=True)                # (1, tb)
        neg = jnp.sum(u * n, axis=0, keepdims=True)                # (1, tb)
        out_ref[...] = jnp.concatenate([pos, neg], axis=0)         # (2, tb)

    # VMEM budget: single-buffered resident tables + double-buffered id/out
    # streams + per-step one-hot / gathered intermediates, with 2x headroom,
    # capped at 85% of this generation's per-core VMEM (64 MiB v7x fallback).
    table_bytes = (user_t.size * user_t.dtype.itemsize
                   + item_t.size * item_t.dtype.itemsize)
    stream_bytes = 2 * ((tb + 2 * tb) * 4 + 2 * tb * 4)
    oh_item = user_t.dtype.itemsize
    work_bytes = ((chunk_u * tb + chunk_i * 2 * tb) * (4 + oh_item)
                  + 3 * latent_dim * tb * 4)
    need = table_bytes + stream_bytes + work_bytes
    try:
        vmem_cap = int(pltpu.get_tpu_info().vmem_capacity_bytes)
    except Exception:
        vmem_cap = 64 * 1024 * 1024        # v7x per-TensorCore VMEM
    vmem_limit = int(min(0.85 * vmem_cap, max(32 * 1024 * 1024, 2 * need)))

    flops = (2 * b_pad * ru_pad * latent_dim           # user one-hot contraction
             + 2 * (2 * b_pad) * ri_pad * latent_dim   # fused pos/neg item contraction
             + 4 * b_pad * latent_dim)                 # elementwise mul + reduce
    bytes_accessed = table_bytes + 3 * b_pad * 4 + 2 * b_pad * 4

    out = pl.pallas_call(
        kernel,
        out_shape=jax.ShapeDtypeStruct((2, b_pad), jnp.float32),
        grid_spec=pltpu.PrefetchScalarGridSpec(
            num_scalar_prefetch=0,
            grid=(n_steps,),
            in_specs=[
                pl.BlockSpec((1, tb), lambda i: (0, i)),        # uids (lane-dense)
                pl.BlockSpec((1, 2 * tb), lambda i: (0, i)),    # [pos|neg] item ids
                # Whole tables VMEM-resident, single buffer (no pointless
                # double-buffering of constant-index blocks).
                pl.BlockSpec(memory_space=pltpu.MemorySpace.VMEM),
                pl.BlockSpec(memory_space=pltpu.MemorySpace.VMEM),
            ],
            out_specs=pl.BlockSpec((2, tb), lambda i: (0, i)),  # lane-dense slab
        ),
        compiler_params=pltpu.CompilerParams(
            dimension_semantics=("parallel",),       # batch grid -> both TCs on v7x
            vmem_limit_bytes=vmem_limit,
        ),
        cost_estimate=pl.CostEstimate(
            flops=flops, transcendentals=0, bytes_accessed=bytes_accessed),
    )(u_ids, pn_ids, user_t, item_t)

    return out[0, :batch], out[1, :batch]


if __name__ == "__main__":
    # Synthetic module configuration (matches BrpMF.__init__ shapes).
    user_num, item_num, latent_dim = 50, 80, 32
    batch = 8

    key = jax.random.PRNGKey(0)
    k_u, k_i, k_uid, k_pos, k_neg = jax.random.split(key, 5)

    # nn.init.normal_(..., std=0.01) on both embedding tables.
    user_emb = (0.01 * jax.random.normal(k_u, (user_num, latent_dim))).astype(jnp.float32)
    item_emb = (0.01 * jax.random.normal(k_i, (item_num, latent_dim))).astype(jnp.float32)

    # LongTensor indices -> int32 on TPU (values fit comfortably).
    uids = jax.random.randint(k_uid, (batch,), 0, user_num, dtype=jnp.int32)
    pos_iids = jax.random.randint(k_pos, (batch,), 0, item_num, dtype=jnp.int32)
    neg_iids = jax.random.randint(k_neg, (batch,), 0, item_num, dtype=jnp.int32)

    pos_preds, neg_preds = jax.jit(bpr_mf_forward)(
        uids, pos_iids, neg_iids, user_emb, item_emb)
    jax.block_until_ready((pos_preds, neg_preds))
    assert pos_preds.shape == (batch,) and neg_preds.shape == (batch,)

    # Reference 1: exact match to the kernel's bf16 table storage (gather
    # selection is exact; only table values are bf16-rounded).
    u_bf = user_emb.astype(jnp.bfloat16).astype(jnp.float32)
    i_bf = item_emb.astype(jnp.bfloat16).astype(jnp.float32)
    pos_ref_bf = (u_bf[uids] * i_bf[pos_iids]).sum(axis=1)
    neg_ref_bf = (u_bf[uids] * i_bf[neg_iids]).sum(axis=1)
    assert jnp.allclose(pos_preds, pos_ref_bf, atol=1e-6, rtol=1e-5)
    assert jnp.allclose(neg_preds, neg_ref_bf, atol=1e-6, rtol=1e-5)

    # Reference 2: original f32 module semantics (loose tolerance: bf16 tables).
    pos_ref = (user_emb[uids] * item_emb[pos_iids]).sum(axis=1)
    neg_ref = (user_emb[uids] * item_emb[neg_iids]).sum(axis=1)
    assert jnp.allclose(pos_preds, pos_ref, atol=1e-4, rtol=5e-2)
    assert jnp.allclose(neg_preds, neg_ref, atol=1e-4, rtol=5e-2)

    print("KERNEL_OK")
</pallas_src>

<mosaic_0001>
module attributes {stable_mosaic.version = 11 : i64} {
  func.func @kernel(%arg0: i32, %arg1: memref<1x128xi32, #tpu.memory_space<vmem>>, %arg2: memref<1x256xi32, #tpu.memory_space<vmem>>, %arg3: memref<32x128xbf16, #tpu.memory_space<vmem>>, %arg4: memref<32x128xbf16, #tpu.memory_space<vmem>>, %arg5: memref<2x128xf32, #tpu.memory_space<vmem>>) attributes {dimension_semantics = [#tpu.dimension_semantics<parallel>], iteration_bounds = array<i64: 2>, scalar_prefetch = 0 : i64, scratch_operands = 0 : i64, tpu.core_type = #tpu.core_type<tc>, window_params = [{transform_indices = @transform_0, window_bounds = array<i64: 1, 128>}, {transform_indices = @transform_1, window_bounds = array<i64: 1, 256>}, {pipeline_mode = #tpu.pipeline_mode<synchronous>, transform_indices = @transform_2, window_bounds = array<i64: 32, 128>}, {pipeline_mode = #tpu.pipeline_mode<synchronous>, transform_indices = @transform_3, window_bounds = array<i64: 32, 128>}, {transform_indices = @transform_4, window_bounds = array<i64: 2, 128>}]} {
    %c0 = arith.constant 0 : index
    %c0_0 = arith.constant 0 : index
    %0 = vector.load %arg1[%c0, %c0_0] : memref<1x128xi32, #tpu.memory_space<vmem>>, vector<1x128xi32>
    %1 = tpu.iota {dimensions = array<i32: 0>} : vector<128x128xi32>
    %c0_i32 = arith.constant 0 : i32
    %2 = vector.broadcast %c0_i32 : i32 to vector<128x128xi32>
    %3 = arith.addi %1, %2 : vector<128x128xi32>
    %4 = vector.broadcast %0 : vector<1x128xi32> to vector<128x128xi32>
    %5 = arith.cmpi eq, %3, %4 : vector<128x128xi32>
    %6 = arith.extui %5 : vector<128x128xi1> to vector<128x128xi32>
    %7 = arith.sitofp %6 : vector<128x128xi32> to vector<128x128xf32>
    %8 = arith.truncf %7 : vector<128x128xf32> to vector<128x128xbf16>
    %c0_1 = arith.constant 0 : index
    %c0_2 = arith.constant 0 : index
    %9 = vector.load %arg3[%c0_1, %c0_2] : memref<32x128xbf16, #tpu.memory_space<vmem>>, vector<32x128xbf16>
    %cst = arith.constant dense<0.000000e+00> : vector<32x128xf32>
    %10 = tpu.matmul %9, %8, %cst {dimension_numbers = #tpu.dot_dimension_numbers<[1], [0], [0], [1], [0, 0, 1, 1], [], []>} : vector<32x128xbf16>, vector<128x128xbf16>, vector<32x128xf32> -> vector<32x128xf32>
    %c0_3 = arith.constant 0 : index
    %c0_4 = arith.constant 0 : index
    %11 = vector.load %arg2[%c0_3, %c0_4] : memref<1x256xi32, #tpu.memory_space<vmem>>, vector<1x256xi32>
    %12 = tpu.iota {dimensions = array<i32: 0>} : vector<128x256xi32>
    %c0_i32_5 = arith.constant 0 : i32
    %13 = vector.broadcast %c0_i32_5 : i32 to vector<128x256xi32>
    %14 = arith.addi %12, %13 : vector<128x256xi32>
    %15 = vector.broadcast %11 : vector<1x256xi32> to vector<128x256xi32>
    %16 = arith.cmpi eq, %14, %15 : vector<128x256xi32>
    %17 = arith.extui %16 : vector<128x256xi1> to vector<128x256xi32>
    %18 = arith.sitofp %17 : vector<128x256xi32> to vector<128x256xf32>
    %19 = arith.truncf %18 : vector<128x256xf32> to vector<128x256xbf16>
    %c0_6 = arith.constant 0 : index
    %c0_7 = arith.constant 0 : index
    %20 = vector.load %arg4[%c0_6, %c0_7] : memref<32x128xbf16, #tpu.memory_space<vmem>>, vector<32x128xbf16>
    %cst_8 = arith.constant dense<0.000000e+00> : vector<32x256xf32>
    %21 = tpu.matmul %20, %19, %cst_8 {dimension_numbers = #tpu.dot_dimension_numbers<[1], [0], [0], [1], [0, 0, 1, 1], [], []>} : vector<32x128xbf16>, vector<128x256xbf16>, vector<32x256xf32> -> vector<32x256xf32>
    %22 = vector.extract_strided_slice %21 {offsets = [0, 0], sizes = [32, 128], strides = [1, 1]} : vector<32x256xf32> to vector<32x128xf32>
    %23 = vector.extract_strided_slice %21 {offsets = [0, 128], sizes = [32, 128], strides = [1, 1]} : vector<32x256xf32> to vector<32x128xf32>
    %24 = arith.mulf %10, %22 : vector<32x128xf32>
    %cst_9 = arith.constant dense<0.000000e+00> : vector<128xf32>
    %25 = vector.multi_reduction <add>, %24, %cst_9 [0] : vector<32x128xf32> to vector<128xf32>
    %26 = vector.shape_cast %25 : vector<128xf32> to vector<1x128xf32>
    %27 = arith.mulf %10, %23 : vector<32x128xf32>
    %cst_10 = arith.constant dense<0.000000e+00> : vector<128xf32>
    %28 = vector.multi_reduction <add>, %27, %cst_10 [0] : vector<32x128xf32> to vector<128xf32>
    %29 = vector.shape_cast %28 : vector<128xf32> to vector<1x128xf32>
    %30 = tpu.concatenate %26, %29 in 0 : vector<1x128xf32>, vector<1x128xf32> -> vector<2x128xf32>
    %c0_11 = arith.constant 0 : index
    %c0_12 = arith.constant 0 : index
    %31 = vector.load %arg5[%c0_11, %c0_12] : memref<2x128xf32, #tpu.memory_space<vmem>>, vector<2x128xf32>
    tpu.vector_store %arg5[%c0_11, %c0_12], %30 {strides = array<i32>} : memref<2x128xf32, #tpu.memory_space<vmem>>, vector<2x128xf32>,
    return
  }
  func.func @transform_0(%arg0: i32) -> (i32, i32) {
    %c0_i32 = arith.constant 0 : i32
    %c0_i32_0 = arith.constant 0 : i32
    return %c0_i32, %arg0 : i32, i32
  }
  func.func @transform_1(%arg0: i32) -> (i32, i32) {
    %c0_i32 = arith.constant 0 : i32
    %c0_i32_0 = arith.constant 0 : i32
    return %c0_i32, %arg0 : i32, i32
  }
  func.func @transform_2(%arg0: i32) -> (i32, i32) {
    %c0_i32 = arith.constant 0 : i32
    %c0_i32_0 = arith.constant 0 : i32
    %c0_i32_1 = arith.constant 0 : i32
    return %c0_i32, %c0_i32_0 : i32, i32
  }
  func.func @transform_3(%arg0: i32) -> (i32, i32) {
    %c0_i32 = arith.constant 0 : i32
    %c0_i32_0 = arith.constant 0 : i32
    %c0_i32_1 = arith.constant 0 : i32
    return %c0_i32, %c0_i32_0 : i32, i32
  }
  func.func @transform_4(%arg0: i32) -> (i32, i32) {
    %c0_i32 = arith.constant 0 : i32
    %c0_i32_0 = arith.constant 0 : i32
    return %c0_i32, %arg0 : i32, i32
  }
}

</mosaic_0001>

<bundles_post_ra>
// kernel: bpr_mf_forward.1
= control target key start
LH: loop header
LB: loop body
LE: loop exit
PB: predicated region body
PF: predicated region fallthrough
CT: control target
= control target key end

     0   :  { %s753_s15 = smov 0   ;;  %s943_s0 = inlined_call_operand.vmem [shape: s32[1,256], index: 0, kind: input, shape index: {}]   ;;  %s944_s1 = inlined_call_operand.vmem [shape: s32[1,512], index: 1, kind: input, shape index: {}]   ;;  %s945_s2 = inlined_call_operand.vmem [shape: bf16[32,128], index: 2, kind: input, shape index: {}]   ;;  %s946_s3 = inlined_call_operand.vmem [shape: bf16[32,128], index: 3, kind: input, shape index: {}]   ;;  %s947_s4 = inlined_call_operand.vmem [shape: f32[2,256], index: 4, kind: output, shape index: {}]  }
   0x1 LB: > { %s576_s16 = sadd.s32 4294967295, %s725_s15   ;;  %p580_p0 = scmp.ge.s32.totalorder %s725_s15, 1  ;;  %s725_s15 = sphi %s753_s15, %s14_s15  }
   0x2   : > { %p170_p1 = scmp.lt.s32.totalorder %s725_s15, 3 }
   0x4   : > { %p171_p2 = pnand %p580_p0, %p170_p1 }
   0x5   : > { %p197_p3 = scmp.lt.s32.totalorder (!%p171_p2), %s576_s16, 1  ;;  %s581_s17 = sshll.u32 (!%p171_p2), %s576_s16, 1 }
   0x6   : > { %174 = sbr.rel (%p171_p2) target bundleno = 227 (0xe3), region = 36  ;;  %p201_p4 = scmp.lt.s32.totalorder (!%p171_p2), %s581_s17, 3 }
   0xb   : > { %v210_v0 = vlaneseq  ;;  %s961_s16 = smov (!%p197_p3, %s576_s16), 1  ;;  %s963_s17 = smov (!%p201_p4, %s581_s17), 3  ;;  %v727_v12 = vmov 1.0|1.0   ;;  %v697_v28 = vld [vmem:[%s945_s2] sm:$0xff]  ;;  %v698_v29 = vld [vmem:[%s945_s2 + $0x8] sm:$0xff] }
   0xc   : > { %s199_s20 = scalar_lea.vmem %s943_s0, %s961_s16  ;;  %s203_s23 = scalar_lea.vmem %s944_s1, %s963_s17  ;;  %v699_v30 = vld [vmem:[%s946_s3] sm:$0xff]  ;;  %v700_v31 = vld [vmem:[%s946_s3 + $0x8] sm:$0xff] }
   0xd   : > { %v763_v1 = vshrl.u32 %v210_v0, 7  ;;  %v773_v6 = vld [vmem:[%s199_s20] ss:$0 sm:$0xff]  ;;  %s582_s6 = sshll.u32 %s961_s16, 1 }
   0xe   : > { %v319_v7 = vld [vmem:[%s203_s23] sm:$0x3]  ;;  %s208_s9 = scalar_lea.vmem %s947_s4, %s582_s6 }
   0xf   : > { %v225_v2 = vadd.s32 112, %v763_v1  ;;  %v226_v3 = vadd.s32 120, %v763_v1  ;;  %v223_v4 = vadd.s32 96, %v763_v1  ;;  %v224_v5 = vadd.s32 104, %v763_v1 }
  0x10   : > { %v221_v8 = vadd.s32 80, %v763_v1  ;;  %v222_v9 = vadd.s32 88, %v763_v1  ;;  %v782_v10 = vperm.slane %v319_v7, 0  ;;  %v784_v11 = vperm.slane %v319_v7, 1 }
  0x11   : > { %vm242_vm0 = vcmp.eq.s32.totalorder %v225_v2, %v773_v6  ;;  %vm243_vm1 = vcmp.eq.s32.totalorder %v226_v3, %v773_v6  ;;  %vm240_vm3 = vcmp.eq.s32.totalorder %v223_v4, %v773_v6  ;;  %vm241_vm4 = vcmp.eq.s32.totalorder %v224_v5, %v773_v6 }
  0x12   : > { %vm607_vm2 = vmpackc.low %vm243_vm1, %vm242_vm0  ;;  %vm350_vm5 = vcmp.eq.s32.totalorder %v225_v2, %v782_v10  ;;  %vm352_vm6 = vcmp.eq.s32.totalorder %v226_v3, %v782_v10  ;;  %vm351_vm7 = vcmp.eq.s32.totalorder %v225_v2, %v784_v11  ;;  %vm353_vm8 = vcmp.eq.s32.totalorder %v226_v3, %v784_v11 }
  0x13   : > { %608 = vmatpush.bf16.msk.msra.mxu0 %vm607_vm2, %v727_v12  ;;  %vm793_vm9 = vmpackc.low %vm241_vm4, %vm240_vm3  ;;  %vm346_vm11 = vcmp.eq.s32.totalorder %v223_v4, %v782_v10  ;;  %vm348_vm12 = vcmp.eq.s32.totalorder %v224_v5, %v782_v10  ;;  %vm347_vm13 = vcmp.eq.s32.totalorder %v223_v4, %v784_v11  ;;  %vm349_vm14 = vcmp.eq.s32.totalorder %v224_v5, %v784_v11 }
  0x14   : > { %vm663_vm10 = vmpackc.low %vm352_vm6, %vm350_vm5  ;;  %701 = vmatpush.bf16.msk.msra.mxu3 %vm607_vm2, %v727_v12  ;;  %vm238_vm0 = vcmp.eq.s32.totalorder %v221_v8, %v773_v6  ;;  %vm239_vm1 = vcmp.eq.s32.totalorder %v222_v9, %v773_v6  ;;  %v219_v14 = vadd.s32 64, %v763_v1  ;;  %v220_v15 = vadd.s32 72, %v763_v1 }
  0x15   : > { %664 = vmatpush.bf16.msk.msra.mxu1 %vm663_vm10, %v727_v12  ;;  %vm679_vm15 = vmpackc.low %vm353_vm8, %vm351_vm7  ;;  %vm342_vm2 = vcmp.eq.s32.totalorder %v221_v8, %v782_v10  ;;  %vm344_vm5 = vcmp.eq.s32.totalorder %v222_v9, %v782_v10  ;;  %vm343_vm7 = vcmp.eq.s32.totalorder %v221_v8, %v784_v11  ;;  %vm345_vm8 = vcmp.eq.s32.totalorder %v222_v9, %v784_v11 }
  0x16   : > { %680 = vmatpush.bf16.msk.msra.mxu2 %vm679_vm15, %v727_v12  ;;  %vm665_vm3 = vmpackc.low %vm348_vm12, %vm346_vm11  ;;  %vm236_vm10 = vcmp.eq.s32.totalorder %v219_v14, %v773_v6  ;;  %vm237_vm11 = vcmp.eq.s32.totalorder %v220_v15, %v773_v6  ;;  %v217_v17 = vadd.s32 48, %v763_v1  ;;  %v218_v18 = vadd.s32 56, %v763_v1 }
  0x17   : > { %610 = vmatpush.bf16.msk.msra.mxu0 %vm793_vm9, %v727_v12  ;;  %vm681_vm4 = vmpackc.low %vm349_vm14, %vm347_vm13  ;;  %vm340_vm14 = vcmp.eq.s32.totalorder %v220_v15, %v782_v10  ;;  %v215_v20 = vadd.s32 32, %v763_v1  ;;  %v216_v21 = vadd.s32 40, %v763_v1  ;;  %v213_v23 = vadd.s32 16, %v763_v1 }
  0x18   : > { %vm813_vm6 = vmpackc.low %vm239_vm1, %vm238_vm0  ;;  %702 = vmatpush.bf16.msk.msra.mxu3 %vm793_vm9, %v727_v12  ;;  %vm338_vm9 = vcmp.eq.s32.totalorder %v219_v14, %v782_v10  ;;  %vm339_vm0 = vcmp.eq.s32.totalorder %v219_v14, %v784_v11  ;;  %vm341_vm1 = vcmp.eq.s32.totalorder %v220_v15, %v784_v11  ;;  %v214_v24 = vadd.s32 24, %v763_v1 }
  0x19   : > { %666 = vmatpush.bf16.msk.msra.mxu1 %vm665_vm3, %v727_v12  ;;  %vm667_vm12 = vmpackc.low %vm344_vm5, %vm342_vm2  ;;  %vm234_vm3 = vcmp.eq.s32.totalorder %v217_v17, %v773_v6  ;;  %v212_v26 = vadd.s32 8, %v763_v1 }
  0x1a   : > { %682 = vmatpush.bf16.msk.msra.mxu2 %vm681_vm4, %v727_v12  ;;  %vm683_vm13 = vmpackc.low %vm345_vm8, %vm343_vm7  ;;  %vm235_vm4 = vcmp.eq.s32.totalorder %v218_v18, %v773_v6  ;;  %vm336_vm7 = vcmp.eq.s32.totalorder %v218_v18, %v782_v10 }
  0x1b   : > { %612 = vmatpush.bf16.msk.msra.mxu0 %vm813_vm6, %v727_v12  ;;  %vm833_vm15 = vmpackc.low %vm237_vm11, %vm236_vm10  ;;  %vm335_vm10 = vcmp.eq.s32.totalorder %v217_v17, %v784_v11  ;;  %vm337_vm11 = vcmp.eq.s32.totalorder %v218_v18, %v784_v11 }
  0x1c   : > { %703 = vmatpush.bf16.msk.msra.mxu3 %vm813_vm6, %v727_v12  ;;  %vm669_vm2 = vmpackc.low %vm340_vm14, %vm338_vm9  ;;  %vm334_vm6 = vcmp.eq.s32.totalorder %v217_v17, %v782_v10 }
  0x1d   : > { %668 = vmatpush.bf16.msk.msra.mxu1 %vm667_vm12, %v727_v12  ;;  %vm685_vm5 = vmpackc.low %vm341_vm1, %vm339_vm0  ;;  %vm232_vm12 = vcmp.eq.s32.totalorder %v215_v20, %v773_v6  ;;  %vm332_vm0 = vcmp.eq.s32.totalorder %v216_v21, %v782_v10 }
  0x1e   : > { %684 = vmatpush.bf16.msk.msra.mxu2 %vm683_vm13, %v727_v12  ;;  %vm853_vm8 = vmpackc.low %vm235_vm4, %vm234_vm3  ;;  %vm233_vm13 = vcmp.eq.s32.totalorder %v216_v21, %v773_v6  ;;  %vm331_vm3 = vcmp.eq.s32.totalorder %v215_v20, %v784_v11  ;;  %vm333_vm4 = vcmp.eq.s32.totalorder %v216_v21, %v784_v11 }
  0x1f   : > { %614 = vmatpush.bf16.msk.msra.mxu0 %vm833_vm15, %v727_v12  ;;  %vm671_vm9 = vmpackc.low %vm336_vm7, %vm334_vm6 }
  0x20   : > { %704 = vmatpush.bf16.msk.msra.mxu3 %vm833_vm15, %v727_v12  ;;  %vm687_vm14 = vmpackc.low %vm337_vm11, %vm335_vm10  ;;  %vm330_vm15 = vcmp.eq.s32.totalorder %v215_v20, %v782_v10  ;;  %vm326_vm10 = vcmp.eq.s32.totalorder %v213_v23, %v782_v10 }
  0x21   : > { %670 = vmatpush.bf16.msk.msra.mxu1 %vm669_vm2, %v727_v12  ;;  %vm873_vm1 = vmpackc.low %vm233_vm13, %vm232_vm12  ;;  %vm230_vm2 = vcmp.eq.s32.totalorder %v213_v23, %v773_v6  ;;  %vm327_vm12 = vcmp.eq.s32.totalorder %v213_v23, %v784_v11  ;;  %vm329_vm13 = vcmp.eq.s32.totalorder %v214_v24, %v784_v11 }
  0x22   : > { %686 = vmatpush.bf16.msk.msra.mxu2 %vm685_vm5, %v727_v12  ;;  %vm231_vm5 = vcmp.eq.s32.totalorder %v214_v24, %v773_v6  ;;  %vm673_vm6 = vmpackc.low %vm332_vm0, %vm330_vm15 }
  0x23   : > { %616 = vmatpush.bf16.msk.msra.mxu0 %vm853_vm8, %v727_v12  ;;  %vm689_vm7 = vmpackc.low %vm333_vm4, %vm331_vm3  ;;  %vm322_vm3 = vcmp.eq.s32.totalorder %v763_v1, %v782_v10 }
  0x24   : > { %705 = vmatpush.bf16.msk.msra.mxu3 %vm853_vm8, %v727_v12  ;;  %vm328_vm8 = vcmp.eq.s32.totalorder %v214_v24, %v782_v10  ;;  %vm892_vm11 = vmpackc.low %vm231_vm5, %vm230_vm2  ;;  %vm323_vm2 = vcmp.eq.s32.totalorder %v763_v1, %v784_v11  ;;  %vm325_vm5 = vcmp.eq.s32.totalorder %v212_v26, %v784_v11 }
  0x25   : > { %672 = vmatpush.bf16.msk.msra.mxu1 %vm671_vm9, %v727_v12  ;;  %vm228_vm9 = vcmp.eq.s32.totalorder %v763_v1, %v773_v6  ;;  %vm675_vm15 = vmpackc.low %vm328_vm8, %vm326_vm10  ;;  %vm514_vm10 = vcmask 1040384  }
  0x26   : > { %688 = vmatpush.bf16.msk.msra.mxu2 %vm687_vm14, %v727_v12  ;;  %vm229_vm14 = vcmp.eq.s32.totalorder %v212_v26, %v773_v6  ;;  %vm691_vm0 = vmpackc.low %vm329_vm13, %vm327_vm12 }
  0x27   : > { %618 = vmatpush.bf16.msk.msra.mxu0 %vm873_vm1, %v727_v12  ;;  %vm621_vm4 = vmpackc.low %vm229_vm14, %vm228_vm9 }
  0x28   : > { %706 = vmatpush.bf16.msk.msra.mxu3 %vm873_vm1, %v727_v12  ;;  %vm324_vm1 = vcmp.eq.s32.totalorder %v212_v26, %v782_v10 }
  0x29   : > { %674 = vmatpush.bf16.msk.msra.mxu1 %vm673_vm6, %v727_v12  ;;  %vm677_vm6 = vmpackc.low %vm324_vm1, %vm322_vm3 }
  0x2a   : > { %690 = vmatpush.bf16.msk.msra.mxu2 %vm689_vm7, %v727_v12  ;;  %vm693_vm7 = vmpackc.low %vm325_vm5, %vm323_vm2 }
  0x2b   : > { %620 = vmatpush.bf16.msk.msra.mxu0 %vm892_vm11, %v727_v12 }
  0x2c   : > { %707 = vmatpush.bf16.msk.msra.mxu3 %vm892_vm11, %v727_v12 }
  0x2d   : > { %676 = vmatpush.bf16.msk.msra.mxu1 %vm675_vm15, %v727_v12 }
  0x2e   : > { %692 = vmatpush.bf16.msk.msra.mxu2 %vm691_vm0, %v727_v12 }
  0x2f   : > { %622 = vmatpush.bf16.msk.msra.mxu0 %vm621_vm4, %v727_v12 }
  0x30   : > { %708 = vmatpush.bf16.msk.msra.mxu3 %vm621_vm4, %v727_v12 }
  0x31   : > { %678 = vmatpush.bf16.msk.msra.mxu1 %vm677_vm6, %v727_v12 }
  0x32   : > { %694 = vmatpush.bf16.msk.msra.mxu2 %vm693_vm7, %v727_v12  ;;  %308 = vmatmul.bf16.vlgmr.msra.gmra.mxu0 %v697_v28 }
  0x33   : > { %313 = vmatmul.bf16.vlgmr.msra.gmra.mxu3 %v698_v29 }
  0x34   : > { %458 = vmatmul.bf16.vlgmr.msra.gmra.mxu1 %v699_v30 }
  0x35   : > { %477 = vmatmul.bf16.vlgmr.msra.gmra.mxu2 %v699_v30 }
  0x44   : > { %463 = vmatmul.bf16.gmra.mxu1 %v700_v31 }
  0x45   : > { %482 = vmatmul.bf16.gmra.mxu2 %v700_v31 }
  0xaf   : > { %v309_v33 = vpop.f32.mrf.mxu0 }
  0xb1   : > { %v459_v32 = vpop.f32.mrf.mxu1 }
  0xb2   : > { %v488_v41 = vmul.f32 %v459_v32, %v309_v33 }
  0xb6   : > { %v314_v36 = vpop.f32.mrf.mxu3 }
  0xb7   : > { %v311_v38 = vpop.f32.mrf.mxu0 }
  0xb8   : > { %v478_v34 = vpop.f32.mrf.mxu2 }
  0xb9   : > { %v461_v35 = vpop.f32.mrf.mxu1  ;;  %v501_v51 = vmul.f32 %v478_v34, %v309_v33 }
  0xba   : > { %v489_v40 = vmul.f32 %v461_v35, %v311_v38 }
  0xbc   : > { %v492_v43 = vadd.f32 %v489_v40, %v488_v41 }
  0xbe   : > { %v316_v45 = vpop.f32.mrf.mxu3 }
  0xc0   : > { %v480_v37 = vpop.f32.mrf.mxu2 }
  0xc1   : > { %v464_v39 = vpop.f32.mrf.mxu1  ;;  %v502_v49 = vmul.f32 %v480_v37, %v311_v38 }
  0xc2   : > { %v490_v42 = vmul.f32 %v464_v39, %v314_v36 }
  0xc3   : > { %v505_v54 = vadd.f32 %v502_v49, %v501_v51 }
  0xc4   : > { %v493_v47 = vadd.f32 %v492_v43, %v490_v42 }
  0xc8   : > { %v483_v44 = vpop.f32.mrf.mxu2 }
  0xc9   : > { %v466_v46 = vpop.f32.mrf.mxu1  ;;  %v503_v52 = vmul.f32 %v483_v44, %v314_v36 }
  0xca   : > { %v491_v48 = vmul.f32 %v466_v46, %v316_v45 }
  0xcb   : > { %v506_v57 = vadd.f32 %v505_v54, %v503_v52 }
  0xcc   : > { %v494_v50 = vadd.f32 %v493_v47, %v491_v48 }
  0xce   : > { %v495_v53 = vrot.slane %v494_v50, 4 }
  0xd0   : > { %v496_v55 = vadd.f32 %v495_v53, %v494_v50  ;;  %v485_v56 = vpop.f32.mrf.mxu2 }
  0xd1   : > { %v504_v58 = vmul.f32 %v485_v56, %v316_v45 }
  0xd2   : > { %v497_v59 = vrot.slane %v496_v55, 2 }
  0xd3   : > { %v507_v60 = vadd.f32 %v506_v57, %v504_v58 }
  0xd4   : > { %v498_v62 = vadd.f32 %v497_v59, %v496_v55 }
  0xd5   : > { %v508_v61 = vrot.slane %v507_v60, 4 }
  0xd6   : > { %v499_v1 = vrot.slane %v498_v62, 1 }
  0xd7   : > { %v509_v63 = vadd.f32 %v508_v61, %v507_v60 }
  0xd8   : > { %v500_v4 = vadd.f32 %v499_v1, %v498_v62 }
  0xd9   : > { %v510_v0 = vrot.slane %v509_v63, 2 }
  0xdb   : > { %v511_v2 = vadd.f32 %v510_v0, %v509_v63 }
  0xdd   : > { %v512_v3 = vrot.slane %v511_v2, 1 }
  0xdf   : > { %v513_v5 = vadd.f32 %v512_v3, %v511_v2 }
  0xe1   : > { %v515_v6 = vsel %vm514_vm10, %v500_v4, %v513_v5 }
  0xe2   : > { %516 = vst [vmem:[%s208_s9] sm:$0x3] %v515_v6 }
  0xe3 PF: > { %s14_s15 = sadd.s32 1, %s725_s15  }
  0xe4   : > { %p11_p5 = scmp.ge.s32.totalorder %s14_s15, 4  }
  0xe6   :  { %13 = sbr.rel (!%p11_p5) target bundleno = 1 (0x1), region = 69 }

</bundles_post_ra>
